<compile_context>
chip_gen: v7x
topology: tpu7x:2x2x1
jax: 0.10.0
libtpu: 0.0.40
codegen_flags: <defaults>
</compile_context>

<pallas_src>
import jax
import jax.numpy as jnp
from jax import lax
from jax.experimental import pallas as pl
from jax.experimental.pallas import tpu as pltpu

# Small deterministic problem sizes (consistent with the module's __init__).
B, T = 2, 8           # batch, sequence length
V, E, H = 50, 32, 32  # voc_size, emb_size, hidden_size
PAD = 0               # padding_index
DEC = 16              # decoder hidden width
NEG_BIG = -1e30       # "minus infinity" for the masked softmax


def _mod_b(x):
    # B is a power of two in this config; keep a generic fallback.
    return (x & (B - 1)) if (B & (B - 1)) == 0 else (x % B)


def lstm_attention_kernel(tok_ref, emb_ref, w_ih_ref, w_hh_ref, b_ref,
                          w_om_ref, u_om_ref,
                          w1_ref, b1_ref, w2_ref, b2_ref,
                          out_ref,
                          gx_scr, x_scr):
    # ---- embedding gather as a one-hot matmul (time-major rows r = t*B + b) -
    vocab_ids = lax.broadcasted_iota(jnp.int32, (T * B, V), 1)     # (T*B, V)
    one_hot = (tok_ref[...] == vocab_ids).astype(jnp.float32)      # (T*B, V)
    xemb = jnp.dot(one_hot, emb_ref[...],
                   preferred_element_type=jnp.float32)             # (T*B, E)

    # ---- hoisted input projection: one (T*B, E) @ (E, 4H) matmul ------------
    gx_scr[...] = (jnp.dot(xemb, w_ih_ref[...],
                           preferred_element_type=jnp.float32)
                   + b_ref[...])                                   # (T*B, 4H)
    w_hh = w_hh_ref[...]                                           # (H, 4H)

    # ---- LSTM recurrence (PyTorch gate order i, f, g, o), fully unrolled ----
    h = jnp.zeros((B, H), jnp.float32)
    c = jnp.zeros((B, H), jnp.float32)
    for t in range(T):                             # static trip count -> unrolled
        gates = gx_scr[pl.ds(t * B, B), :] + jnp.dot(
            h, w_hh, preferred_element_type=jnp.float32)           # (B, 4H)
        sg = jax.nn.sigmoid(gates)                 # one EUP pass over all gates
        th = jnp.tanh(gates)                       # one EUP pass
        i_g = sg[:, 0:H]
        f_g = sg[:, H:2 * H]
        g_g = th[:, 2 * H:3 * H]
        o_g = sg[:, 3 * H:4 * H]
        c = f_g * c + i_g * g_g
        h = o_g * jnp.tanh(c)
        x_scr[pl.ds(t * B, B), :] = h              # static sublane-offset store

    x2 = x_scr[...]                                # (T*B, H) aligned slab

    # ---- attention: u = tanh(x W_omega); att = u u_omega; softmax over time -
    u = jnp.tanh(jnp.dot(x2, w_om_ref[...], preferred_element_type=jnp.float32))
    att = jnp.dot(u, u_om_ref[...], preferred_element_type=jnp.float32)  # (T*B, 1)

    # Masked softmax over the T rows belonging to each batch column b:
    # sel[r, b] = (r % B == b); masked entries get -1e30 so exp underflows to 0.
    row_ids = lax.broadcasted_iota(jnp.int32, (T * B, B), 0)
    col_ids = lax.broadcasted_iota(jnp.int32, (T * B, B), 1)
    sel = _mod_b(row_ids) == col_ids                       # (T*B, B)
    att_m = jnp.where(sel, att, jnp.float32(NEG_BIG))
    m = jnp.max(att_m, axis=0, keepdims=True)              # (1, B) per-batch max
    e = jnp.exp(att_m - m)
    den = jnp.sum(e, axis=0, keepdims=True)                # (1, B)
    inv_den = pl.reciprocal(den, approx=False)             # exact; approx=True -> EUP
    score = e * inv_den                                    # (T*B, B), zeros off-group
    srow = jnp.sum(score, axis=1, keepdims=True)           # (T*B, 1): weight of row r

    # feat[b, :] = sum_t score[t, b] * h_t[b, :], as one standard MXU matmul:
    # sel_bt is a constant 0/1 selection matrix, so no transposed contraction.
    r_ids2 = lax.broadcasted_iota(jnp.int32, (B, T * B), 1)
    b_ids2 = lax.broadcasted_iota(jnp.int32, (B, T * B), 0)
    sel_bt = (_mod_b(r_ids2) == b_ids2).astype(jnp.float32)        # (B, T*B)
    feat = jnp.dot(sel_bt, x2 * srow,
                   preferred_element_type=jnp.float32)             # (B, H)

    # ---- decoder: Linear(H, 16) -> ReLU -> Linear(16, 1) -> Sigmoid ---------
    hdec = jnp.maximum(
        jnp.dot(feat, w1_ref[...], preferred_element_type=jnp.float32)
        + b1_ref[...], 0.0)
    out = jax.nn.sigmoid(
        jnp.dot(hdec, w2_ref[...], preferred_element_type=jnp.float32)
        + b2_ref[...])
    out_ref[...] = out.astype(out_ref.dtype)


@jax.jit
def lstm_attention_pallas(tokens, p):
    # Time-major token column: row r = t*B + b holds tokens[b, t].
    tok_col = tokens.astype(jnp.int32).T.reshape(T * B, 1)
    vmem = pl.BlockSpec(memory_space=pltpu.MemorySpace.VMEM)
    return pl.pallas_call(
        lstm_attention_kernel,
        out_shape=jax.ShapeDtypeStruct((B, 1), jnp.float32),
        in_specs=[vmem] * 11,
        out_specs=vmem,
        scratch_shapes=[
            pltpu.VMEM((T * B, 4 * H), jnp.float32),   # hoisted input gates
            pltpu.VMEM((T * B, H), jnp.float32),       # all LSTM hidden states
        ],
    )(tok_col, p["emb"], p["w_ih"], p["w_hh"], p["b"],
      p["w_omega"], p["u_omega"], p["w1"], p["b1"], p["w2"], p["b2"])


def init_params(key):
    ks = jax.random.split(key, 11)
    emb = jax.random.normal(ks[0], (V, E), jnp.float32)
    emb = emb.at[PAD].set(0.0)                     # padding_idx row is zero
    k = 1.0 / jnp.sqrt(jnp.float32(H))
    w_ih = jax.random.uniform(ks[1], (E, 4 * H), jnp.float32, -k, k)
    w_hh = jax.random.uniform(ks[2], (H, 4 * H), jnp.float32, -k, k)
    b_ih = jax.random.uniform(ks[3], (1, 4 * H), jnp.float32, -k, k)
    b_hh = jax.random.uniform(ks[4], (1, 4 * H), jnp.float32, -k, k)
    w_omega = jax.random.uniform(ks[5], (H, H), jnp.float32, -0.1, 0.1)
    u_omega = jax.random.uniform(ks[6], (H, 1), jnp.float32, -0.1, 0.1)
    k1 = 1.0 / jnp.sqrt(jnp.float32(H))
    w1 = jax.random.uniform(ks[7], (H, DEC), jnp.float32, -k1, k1)
    b1 = jax.random.uniform(ks[8], (1, DEC), jnp.float32, -k1, k1)
    k2 = 1.0 / jnp.sqrt(jnp.float32(DEC))
    w2 = jax.random.uniform(ks[9], (DEC, 1), jnp.float32, -k2, k2)
    b2 = jax.random.uniform(ks[10], (1, 1), jnp.float32, -k2, k2)
    return dict(emb=emb,
                w_ih=w_ih, w_hh=w_hh, b=b_ih + b_hh,
                w_omega=w_omega, u_omega=u_omega,
                w1=w1, b1=b1, w2=w2, b2=b2)


def lstm_attention_ref(tokens, p):
    """Pure-JAX reference matching the PyTorch forward."""
    emb = p["emb"][tokens]                         # (B, T, E)
    emb = jnp.transpose(emb, (1, 0, 2))            # (T, B, E)

    def step(carry, x_t):
        h, c = carry
        gates = x_t @ p["w_ih"] + h @ p["w_hh"] + p["b"]
        i_g = jax.nn.sigmoid(gates[:, 0:H])
        f_g = jax.nn.sigmoid(gates[:, H:2 * H])
        g_g = jnp.tanh(gates[:, 2 * H:3 * H])
        o_g = jax.nn.sigmoid(gates[:, 3 * H:4 * H])
        c = f_g * c + i_g * g_g
        h = o_g * jnp.tanh(c)
        return (h, c), h

    h0 = jnp.zeros((B, H), jnp.float32)
    _, outs = lax.scan(step, (h0, h0), emb)        # (T, B, H)
    x = jnp.transpose(outs, (1, 0, 2))             # (B, T, H)
    u = jnp.tanh(x @ p["w_omega"])
    att = u @ p["u_omega"]                         # (B, T, 1)
    score = jax.nn.softmax(att, axis=1)
    feat = jnp.sum(x * score, axis=1)              # (B, H)
    hdec = jnp.maximum(feat @ p["w1"] + p["b1"], 0.0)
    return jax.nn.sigmoid(hdec @ p["w2"] + p["b2"])


if __name__ == "__main__":
    key = jax.random.PRNGKey(0)
    pkey, tkey = jax.random.split(key)
    params = init_params(pkey)
    tokens = jax.random.randint(tkey, (B, T), 0, V, dtype=jnp.int32)

    out = jax.block_until_ready(lstm_attention_pallas(tokens, params))
    ref = jax.block_until_ready(lstm_attention_ref(tokens, params))

    assert out.shape == (B, 1), out.shape
    assert jnp.allclose(out, ref, rtol=1e-4, atol=1e-5), (out, ref)
    print("KERNEL_OK")
</pallas_src>

<mosaic_0001>
module attributes {stable_mosaic.version = 11 : i64} {
  func.func @lstm_attention_kernel(%arg0: memref<16x1xi32, #tpu.memory_space<vmem>>, %arg1: memref<50x32xf32, #tpu.memory_space<vmem>>, %arg2: memref<32x128xf32, #tpu.memory_space<vmem>>, %arg3: memref<32x128xf32, #tpu.memory_space<vmem>>, %arg4: memref<1x128xf32, #tpu.memory_space<vmem>>, %arg5: memref<32x32xf32, #tpu.memory_space<vmem>>, %arg6: memref<32x1xf32, #tpu.memory_space<vmem>>, %arg7: memref<32x16xf32, #tpu.memory_space<vmem>>, %arg8: memref<1x16xf32, #tpu.memory_space<vmem>>, %arg9: memref<16x1xf32, #tpu.memory_space<vmem>>, %arg10: memref<1x1xf32, #tpu.memory_space<vmem>>, %arg11: memref<2x1xf32, #tpu.memory_space<vmem>>, %arg12: memref<16x128xf32, #tpu.memory_space<vmem>>, %arg13: memref<16x32xf32, #tpu.memory_space<vmem>>) attributes {dimension_semantics = [], scalar_prefetch = 0 : i64, scratch_operands = 2 : i64, tpu.core_type = #tpu.core_type<tc>} {
    %0 = tpu.iota {dimensions = array<i32: 1>} : vector<16x50xi32>
    %c0 = arith.constant 0 : index
    %c0_0 = arith.constant 0 : index
    %1 = vector.load %arg0[%c0, %c0_0] : memref<16x1xi32, #tpu.memory_space<vmem>>, vector<16x1xi32>
    %2 = vector.broadcast %1 : vector<16x1xi32> to vector<16x50xi32>
    %3 = arith.cmpi eq, %2, %0 : vector<16x50xi32>
    %4 = arith.extui %3 : vector<16x50xi1> to vector<16x50xi32>
    %5 = arith.sitofp %4 : vector<16x50xi32> to vector<16x50xf32>
    %c0_1 = arith.constant 0 : index
    %c0_2 = arith.constant 0 : index
    %6 = vector.load %arg1[%c0_1, %c0_2] : memref<50x32xf32, #tpu.memory_space<vmem>>, vector<50x32xf32>
    %cst = arith.constant dense<0.000000e+00> : vector<16x32xf32>
    %7 = tpu.matmul %5, %6, %cst {dimension_numbers = #tpu.dot_dimension_numbers<[1], [0], [0], [1], [0, 0, 1, 1], [], []>} : vector<16x50xf32>, vector<50x32xf32>, vector<16x32xf32> -> vector<16x32xf32>
    %c0_3 = arith.constant 0 : index
    %c0_4 = arith.constant 0 : index
    %8 = vector.load %arg2[%c0_3, %c0_4] : memref<32x128xf32, #tpu.memory_space<vmem>>, vector<32x128xf32>
    %cst_5 = arith.constant dense<0.000000e+00> : vector<16x128xf32>
    %9 = tpu.matmul %7, %8, %cst_5 {dimension_numbers = #tpu.dot_dimension_numbers<[1], [0], [0], [1], [0, 0, 1, 1], [], []>} : vector<16x32xf32>, vector<32x128xf32>, vector<16x128xf32> -> vector<16x128xf32>
    %c0_6 = arith.constant 0 : index
    %c0_7 = arith.constant 0 : index
    %10 = vector.load %arg4[%c0_6, %c0_7] : memref<1x128xf32, #tpu.memory_space<vmem>>, vector<1x128xf32>
    %11 = vector.broadcast %10 : vector<1x128xf32> to vector<16x128xf32>
    %12 = arith.addf %9, %11 : vector<16x128xf32>
    %c0_8 = arith.constant 0 : index
    %c0_9 = arith.constant 0 : index
    %13 = vector.load %arg12[%c0_8, %c0_9] : memref<16x128xf32, #tpu.memory_space<vmem>>, vector<16x128xf32>
    tpu.vector_store %arg12[%c0_8, %c0_9], %12 {strides = array<i32>} : memref<16x128xf32, #tpu.memory_space<vmem>>, vector<16x128xf32>,
    %c0_10 = arith.constant 0 : index
    %c0_11 = arith.constant 0 : index
    %14 = vector.load %arg3[%c0_10, %c0_11] : memref<32x128xf32, #tpu.memory_space<vmem>>, vector<32x128xf32>
    %cst_12 = arith.constant 0.000000e+00 : f32
    %15 = vector.broadcast %cst_12 : f32 to vector<2x32xf32>
    %cst_13 = arith.constant 0.000000e+00 : f32
    %16 = vector.broadcast %cst_13 : f32 to vector<2x32xf32>
    %c0_14 = arith.constant 0 : index
    %c0_15 = arith.constant 0 : index
    %17 = vector.load %arg12[%c0_14, %c0_15] : memref<16x128xf32, #tpu.memory_space<vmem>>, vector<2x128xf32>
    %cst_16 = arith.constant dense<0.000000e+00> : vector<2x128xf32>
    %18 = tpu.matmul %15, %14, %cst_16 {dimension_numbers = #tpu.dot_dimension_numbers<[1], [0], [0], [1], [0, 0, 1, 1], [], []>} : vector<2x32xf32>, vector<32x128xf32>, vector<2x128xf32> -> vector<2x128xf32>
    %19 = arith.addf %17, %18 : vector<2x128xf32>
    %20 = arith.negf %19 : vector<2x128xf32>
    %21 = math.exp %20 : vector<2x128xf32>
    %cst_17 = arith.constant 1.000000e+00 : f32
    %22 = vector.broadcast %cst_17 : f32 to vector<2x128xf32>
    %23 = arith.addf %22, %21 : vector<2x128xf32>
    %24 = arith.divf %22, %23 : vector<2x128xf32>
    %25 = math.tanh %19 : vector<2x128xf32>
    %26 = vector.extract_strided_slice %24 {offsets = [0, 0], sizes = [2, 32], strides = [1, 1]} : vector<2x128xf32> to vector<2x32xf32>
    %27 = vector.extract_strided_slice %24 {offsets = [0, 32], sizes = [2, 32], strides = [1, 1]} : vector<2x128xf32> to vector<2x32xf32>
    %28 = vector.extract_strided_slice %25 {offsets = [0, 64], sizes = [2, 32], strides = [1, 1]} : vector<2x128xf32> to vector<2x32xf32>
    %29 = vector.extract_strided_slice %24 {offsets = [0, 96], sizes = [2, 32], strides = [1, 1]} : vector<2x128xf32> to vector<2x32xf32>
    %30 = arith.mulf %27, %16 : vector<2x32xf32>
    %31 = arith.mulf %26, %28 : vector<2x32xf32>
    %32 = arith.addf %30, %31 : vector<2x32xf32>
    %33 = math.tanh %32 : vector<2x32xf32>
    %34 = arith.mulf %29, %33 : vector<2x32xf32>
    %c0_18 = arith.constant 0 : index
    %c0_19 = arith.constant 0 : index
    %35 = vector.load %arg13[%c0_18, %c0_19] : memref<16x32xf32, #tpu.memory_space<vmem>>, vector<2x32xf32>
    tpu.vector_store %arg13[%c0_18, %c0_19], %34 {strides = array<i32>} : memref<16x32xf32, #tpu.memory_space<vmem>>, vector<2x32xf32>,
    %c2 = arith.constant 2 : index
    %c0_20 = arith.constant 0 : index
    %36 = vector.load %arg12[%c2, %c0_20] : memref<16x128xf32, #tpu.memory_space<vmem>>, vector<2x128xf32>
    %cst_21 = arith.constant dense<0.000000e+00> : vector<2x128xf32>
    %37 = tpu.matmul %34, %14, %cst_21 {dimension_numbers = #tpu.dot_dimension_numbers<[1], [0], [0], [1], [0, 0, 1, 1], [], []>} : vector<2x32xf32>, vector<32x128xf32>, vector<2x128xf32> -> vector<2x128xf32>
    %38 = arith.addf %36, %37 : vector<2x128xf32>
    %39 = arith.negf %38 : vector<2x128xf32>
    %40 = math.exp %39 : vector<2x128xf32>
    %cst_22 = arith.constant 1.000000e+00 : f32
    %41 = vector.broadcast %cst_22 : f32 to vector<2x128xf32>
    %42 = arith.addf %41, %40 : vector<2x128xf32>
    %43 = arith.divf %41, %42 : vector<2x128xf32>
    %44 = math.tanh %38 : vector<2x128xf32>
    %45 = vector.extract_strided_slice %43 {offsets = [0, 0], sizes = [2, 32], strides = [1, 1]} : vector<2x128xf32> to vector<2x32xf32>
    %46 = vector.extract_strided_slice %43 {offsets = [0, 32], sizes = [2, 32], strides = [1, 1]} : vector<2x128xf32> to vector<2x32xf32>
    %47 = vector.extract_strided_slice %44 {offsets = [0, 64], sizes = [2, 32], strides = [1, 1]} : vector<2x128xf32> to vector<2x32xf32>
    %48 = vector.extract_strided_slice %43 {offsets = [0, 96], sizes = [2, 32], strides = [1, 1]} : vector<2x128xf32> to vector<2x32xf32>
    %49 = arith.mulf %46, %32 : vector<2x32xf32>
    %50 = arith.mulf %45, %47 : vector<2x32xf32>
    %51 = arith.addf %49, %50 : vector<2x32xf32>
    %52 = math.tanh %51 : vector<2x32xf32>
    %53 = arith.mulf %48, %52 : vector<2x32xf32>
    %c2_23 = arith.constant 2 : index
    %c0_24 = arith.constant 0 : index
    %54 = vector.load %arg13[%c2_23, %c0_24] : memref<16x32xf32, #tpu.memory_space<vmem>>, vector<2x32xf32>
    tpu.vector_store %arg13[%c2_23, %c0_24], %53 {strides = array<i32>} : memref<16x32xf32, #tpu.memory_space<vmem>>, vector<2x32xf32>,
    %c4 = arith.constant 4 : index
    %c0_25 = arith.constant 0 : index
    %55 = vector.load %arg12[%c4, %c0_25] : memref<16x128xf32, #tpu.memory_space<vmem>>, vector<2x128xf32>
    %cst_26 = arith.constant dense<0.000000e+00> : vector<2x128xf32>
    %56 = tpu.matmul %53, %14, %cst_26 {dimension_numbers = #tpu.dot_dimension_numbers<[1], [0], [0], [1], [0, 0, 1, 1], [], []>} : vector<2x32xf32>, vector<32x128xf32>, vector<2x128xf32> -> vector<2x128xf32>
    %57 = arith.addf %55, %56 : vector<2x128xf32>
    %58 = arith.negf %57 : vector<2x128xf32>
    %59 = math.exp %58 : vector<2x128xf32>
    %cst_27 = arith.constant 1.000000e+00 : f32
    %60 = vector.broadcast %cst_27 : f32 to vector<2x128xf32>
    %61 = arith.addf %60, %59 : vector<2x128xf32>
    %62 = arith.divf %60, %61 : vector<2x128xf32>
    %63 = math.tanh %57 : vector<2x128xf32>
    %64 = vector.extract_strided_slice %62 {offsets = [0, 0], sizes = [2, 32], strides = [1, 1]} : vector<2x128xf32> to vector<2x32xf32>
    %65 = vector.extract_strided_slice %62 {offsets = [0, 32], sizes = [2, 32], strides = [1, 1]} : vector<2x128xf32> to vector<2x32xf32>
    %66 = vector.extract_strided_slice %63 {offsets = [0, 64], sizes = [2, 32], strides = [1, 1]} : vector<2x128xf32> to vector<2x32xf32>
    %67 = vector.extract_strided_slice %62 {offsets = [0, 96], sizes = [2, 32], strides = [1, 1]} : vector<2x128xf32> to vector<2x32xf32>
    %68 = arith.mulf %65, %51 : vector<2x32xf32>
    %69 = arith.mulf %64, %66 : vector<2x32xf32>
    %70 = arith.addf %68, %69 : vector<2x32xf32>
    %71 = math.tanh %70 : vector<2x32xf32>
    %72 = arith.mulf %67, %71 : vector<2x32xf32>
    %c4_28 = arith.constant 4 : index
    %c0_29 = arith.constant 0 : index
    %73 = vector.load %arg13[%c4_28, %c0_29] : memref<16x32xf32, #tpu.memory_space<vmem>>, vector<2x32xf32>
    tpu.vector_store %arg13[%c4_28, %c0_29], %72 {strides = array<i32>} : memref<16x32xf32, #tpu.memory_space<vmem>>, vector<2x32xf32>,
    %c6 = arith.constant 6 : index
    %c0_30 = arith.constant 0 : index
    %74 = vector.load %arg12[%c6, %c0_30] : memref<16x128xf32, #tpu.memory_space<vmem>>, vector<2x128xf32>
    %cst_31 = arith.constant dense<0.000000e+00> : vector<2x128xf32>
    %75 = tpu.matmul %72, %14, %cst_31 {dimension_numbers = #tpu.dot_dimension_numbers<[1], [0], [0], [1], [0, 0, 1, 1], [], []>} : vector<2x32xf32>, vector<32x128xf32>, vector<2x128xf32> -> vector<2x128xf32>
    %76 = arith.addf %74, %75 : vector<2x128xf32>
    %77 = arith.negf %76 : vector<2x128xf32>
    %78 = math.exp %77 : vector<2x128xf32>
    %cst_32 = arith.constant 1.000000e+00 : f32
    %79 = vector.broadcast %cst_32 : f32 to vector<2x128xf32>
    %80 = arith.addf %79, %78 : vector<2x128xf32>
    %81 = arith.divf %79, %80 : vector<2x128xf32>
    %82 = math.tanh %76 : vector<2x128xf32>
    %83 = vector.extract_strided_slice %81 {offsets = [0, 0], sizes = [2, 32], strides = [1, 1]} : vector<2x128xf32> to vector<2x32xf32>
    %84 = vector.extract_strided_slice %81 {offsets = [0, 32], sizes = [2, 32], strides = [1, 1]} : vector<2x128xf32> to vector<2x32xf32>
    %85 = vector.extract_strided_slice %82 {offsets = [0, 64], sizes = [2, 32], strides = [1, 1]} : vector<2x128xf32> to vector<2x32xf32>
    %86 = vector.extract_strided_slice %81 {offsets = [0, 96], sizes = [2, 32], strides = [1, 1]} : vector<2x128xf32> to vector<2x32xf32>
    %87 = arith.mulf %84, %70 : vector<2x32xf32>
    %88 = arith.mulf %83, %85 : vector<2x32xf32>
    %89 = arith.addf %87, %88 : vector<2x32xf32>
    %90 = math.tanh %89 : vector<2x32xf32>
    %91 = arith.mulf %86, %90 : vector<2x32xf32>
    %c6_33 = arith.constant 6 : index
    %c0_34 = arith.constant 0 : index
    %92 = vector.load %arg13[%c6_33, %c0_34] : memref<16x32xf32, #tpu.memory_space<vmem>>, vector<2x32xf32>
    tpu.vector_store %arg13[%c6_33, %c0_34], %91 {strides = array<i32>} : memref<16x32xf32, #tpu.memory_space<vmem>>, vector<2x32xf32>,
    %c8 = arith.constant 8 : index
    %c0_35 = arith.constant 0 : index
    %93 = vector.load %arg12[%c8, %c0_35] : memref<16x128xf32, #tpu.memory_space<vmem>>, vector<2x128xf32>
    %cst_36 = arith.constant dense<0.000000e+00> : vector<2x128xf32>
    %94 = tpu.matmul %91, %14, %cst_36 {dimension_numbers = #tpu.dot_dimension_numbers<[1], [0], [0], [1], [0, 0, 1, 1], [], []>} : vector<2x32xf32>, vector<32x128xf32>, vector<2x128xf32> -> vector<2x128xf32>
    %95 = arith.addf %93, %94 : vector<2x128xf32>
    %96 = arith.negf %95 : vector<2x128xf32>
    %97 = math.exp %96 : vector<2x128xf32>
    %cst_37 = arith.constant 1.000000e+00 : f32
    %98 = vector.broadcast %cst_37 : f32 to vector<2x128xf32>
    %99 = arith.addf %98, %97 : vector<2x128xf32>
    %100 = arith.divf %98, %99 : vector<2x128xf32>
    %101 = math.tanh %95 : vector<2x128xf32>
    %102 = vector.extract_strided_slice %100 {offsets = [0, 0], sizes = [2, 32], strides = [1, 1]} : vector<2x128xf32> to vector<2x32xf32>
    %103 = vector.extract_strided_slice %100 {offsets = [0, 32], sizes = [2, 32], strides = [1, 1]} : vector<2x128xf32> to vector<2x32xf32>
    %104 = vector.extract_strided_slice %101 {offsets = [0, 64], sizes = [2, 32], strides = [1, 1]} : vector<2x128xf32> to vector<2x32xf32>
    %105 = vector.extract_strided_slice %100 {offsets = [0, 96], sizes = [2, 32], strides = [1, 1]} : vector<2x128xf32> to vector<2x32xf32>
    %106 = arith.mulf %103, %89 : vector<2x32xf32>
    %107 = arith.mulf %102, %104 : vector<2x32xf32>
    %108 = arith.addf %106, %107 : vector<2x32xf32>
    %109 = math.tanh %108 : vector<2x32xf32>
    %110 = arith.mulf %105, %109 : vector<2x32xf32>
    %c8_38 = arith.constant 8 : index
    %c0_39 = arith.constant 0 : index
    %111 = vector.load %arg13[%c8_38, %c0_39] : memref<16x32xf32, #tpu.memory_space<vmem>>, vector<2x32xf32>
    tpu.vector_store %arg13[%c8_38, %c0_39], %110 {strides = array<i32>} : memref<16x32xf32, #tpu.memory_space<vmem>>, vector<2x32xf32>,
    %c10 = arith.constant 10 : index
    %c0_40 = arith.constant 0 : index
    %112 = vector.load %arg12[%c10, %c0_40] : memref<16x128xf32, #tpu.memory_space<vmem>>, vector<2x128xf32>
    %cst_41 = arith.constant dense<0.000000e+00> : vector<2x128xf32>
    %113 = tpu.matmul %110, %14, %cst_41 {dimension_numbers = #tpu.dot_dimension_numbers<[1], [0], [0], [1], [0, 0, 1, 1], [], []>} : vector<2x32xf32>, vector<32x128xf32>, vector<2x128xf32> -> vector<2x128xf32>
    %114 = arith.addf %112, %113 : vector<2x128xf32>
    %115 = arith.negf %114 : vector<2x128xf32>
    %116 = math.exp %115 : vector<2x128xf32>
    %cst_42 = arith.constant 1.000000e+00 : f32
    %117 = vector.broadcast %cst_42 : f32 to vector<2x128xf32>
    %118 = arith.addf %117, %116 : vector<2x128xf32>
    %119 = arith.divf %117, %118 : vector<2x128xf32>
    %120 = math.tanh %114 : vector<2x128xf32>
    %121 = vector.extract_strided_slice %119 {offsets = [0, 0], sizes = [2, 32], strides = [1, 1]} : vector<2x128xf32> to vector<2x32xf32>
    %122 = vector.extract_strided_slice %119 {offsets = [0, 32], sizes = [2, 32], strides = [1, 1]} : vector<2x128xf32> to vector<2x32xf32>
    %123 = vector.extract_strided_slice %120 {offsets = [0, 64], sizes = [2, 32], strides = [1, 1]} : vector<2x128xf32> to vector<2x32xf32>
    %124 = vector.extract_strided_slice %119 {offsets = [0, 96], sizes = [2, 32], strides = [1, 1]} : vector<2x128xf32> to vector<2x32xf32>
    %125 = arith.mulf %122, %108 : vector<2x32xf32>
    %126 = arith.mulf %121, %123 : vector<2x32xf32>
    %127 = arith.addf %125, %126 : vector<2x32xf32>
    %128 = math.tanh %127 : vector<2x32xf32>
    %129 = arith.mulf %124, %128 : vector<2x32xf32>
    %c10_43 = arith.constant 10 : index
    %c0_44 = arith.constant 0 : index
    %130 = vector.load %arg13[%c10_43, %c0_44] : memref<16x32xf32, #tpu.memory_space<vmem>>, vector<2x32xf32>
    tpu.vector_store %arg13[%c10_43, %c0_44], %129 {strides = array<i32>} : memref<16x32xf32, #tpu.memory_space<vmem>>, vector<2x32xf32>,
    %c12 = arith.constant 12 : index
    %c0_45 = arith.constant 0 : index
    %131 = vector.load %arg12[%c12, %c0_45] : memref<16x128xf32, #tpu.memory_space<vmem>>, vector<2x128xf32>
    %cst_46 = arith.constant dense<0.000000e+00> : vector<2x128xf32>
    %132 = tpu.matmul %129, %14, %cst_46 {dimension_numbers = #tpu.dot_dimension_numbers<[1], [0], [0], [1], [0, 0, 1, 1], [], []>} : vector<2x32xf32>, vector<32x128xf32>, vector<2x128xf32> -> vector<2x128xf32>
    %133 = arith.addf %131, %132 : vector<2x128xf32>
    %134 = arith.negf %133 : vector<2x128xf32>
    %135 = math.exp %134 : vector<2x128xf32>
    %cst_47 = arith.constant 1.000000e+00 : f32
    %136 = vector.broadcast %cst_47 : f32 to vector<2x128xf32>
    %137 = arith.addf %136, %135 : vector<2x128xf32>
    %138 = arith.divf %136, %137 : vector<2x128xf32>
    %139 = math.tanh %133 : vector<2x128xf32>
    %140 = vector.extract_strided_slice %138 {offsets = [0, 0], sizes = [2, 32], strides = [1, 1]} : vector<2x128xf32> to vector<2x32xf32>
    %141 = vector.extract_strided_slice %138 {offsets = [0, 32], sizes = [2, 32], strides = [1, 1]} : vector<2x128xf32> to vector<2x32xf32>
    %142 = vector.extract_strided_slice %139 {offsets = [0, 64], sizes = [2, 32], strides = [1, 1]} : vector<2x128xf32> to vector<2x32xf32>
    %143 = vector.extract_strided_slice %138 {offsets = [0, 96], sizes = [2, 32], strides = [1, 1]} : vector<2x128xf32> to vector<2x32xf32>
    %144 = arith.mulf %141, %127 : vector<2x32xf32>
    %145 = arith.mulf %140, %142 : vector<2x32xf32>
    %146 = arith.addf %144, %145 : vector<2x32xf32>
    %147 = math.tanh %146 : vector<2x32xf32>
    %148 = arith.mulf %143, %147 : vector<2x32xf32>
    %c12_48 = arith.constant 12 : index
    %c0_49 = arith.constant 0 : index
    %149 = vector.load %arg13[%c12_48, %c0_49] : memref<16x32xf32, #tpu.memory_space<vmem>>, vector<2x32xf32>
    tpu.vector_store %arg13[%c12_48, %c0_49], %148 {strides = array<i32>} : memref<16x32xf32, #tpu.memory_space<vmem>>, vector<2x32xf32>,
    %c14 = arith.constant 14 : index
    %c0_50 = arith.constant 0 : index
    %150 = vector.load %arg12[%c14, %c0_50] : memref<16x128xf32, #tpu.memory_space<vmem>>, vector<2x128xf32>
    %cst_51 = arith.constant dense<0.000000e+00> : vector<2x128xf32>
    %151 = tpu.matmul %148, %14, %cst_51 {dimension_numbers = #tpu.dot_dimension_numbers<[1], [0], [0], [1], [0, 0, 1, 1], [], []>} : vector<2x32xf32>, vector<32x128xf32>, vector<2x128xf32> -> vector<2x128xf32>
    %152 = arith.addf %150, %151 : vector<2x128xf32>
    %153 = arith.negf %152 : vector<2x128xf32>
    %154 = math.exp %153 : vector<2x128xf32>
    %cst_52 = arith.constant 1.000000e+00 : f32
    %155 = vector.broadcast %cst_52 : f32 to vector<2x128xf32>
    %156 = arith.addf %155, %154 : vector<2x128xf32>
    %157 = arith.divf %155, %156 : vector<2x128xf32>
    %158 = math.tanh %152 : vector<2x128xf32>
    %159 = vector.extract_strided_slice %157 {offsets = [0, 0], sizes = [2, 32], strides = [1, 1]} : vector<2x128xf32> to vector<2x32xf32>
    %160 = vector.extract_strided_slice %157 {offsets = [0, 32], sizes = [2, 32], strides = [1, 1]} : vector<2x128xf32> to vector<2x32xf32>
    %161 = vector.extract_strided_slice %158 {offsets = [0, 64], sizes = [2, 32], strides = [1, 1]} : vector<2x128xf32> to vector<2x32xf32>
    %162 = vector.extract_strided_slice %157 {offsets = [0, 96], sizes = [2, 32], strides = [1, 1]} : vector<2x128xf32> to vector<2x32xf32>
    %163 = arith.mulf %160, %146 : vector<2x32xf32>
    %164 = arith.mulf %159, %161 : vector<2x32xf32>
    %165 = arith.addf %163, %164 : vector<2x32xf32>
    %166 = math.tanh %165 : vector<2x32xf32>
    %167 = arith.mulf %162, %166 : vector<2x32xf32>
    %c14_53 = arith.constant 14 : index
    %c0_54 = arith.constant 0 : index
    %168 = vector.load %arg13[%c14_53, %c0_54] : memref<16x32xf32, #tpu.memory_space<vmem>>, vector<2x32xf32>
    tpu.vector_store %arg13[%c14_53, %c0_54], %167 {strides = array<i32>} : memref<16x32xf32, #tpu.memory_space<vmem>>, vector<2x32xf32>,
    %c0_55 = arith.constant 0 : index
    %c0_56 = arith.constant 0 : index
    %169 = vector.load %arg13[%c0_55, %c0_56] : memref<16x32xf32, #tpu.memory_space<vmem>>, vector<16x32xf32>
    %c0_57 = arith.constant 0 : index
    %c0_58 = arith.constant 0 : index
    %170 = vector.load %arg5[%c0_57, %c0_58] : memref<32x32xf32, #tpu.memory_space<vmem>>, vector<32x32xf32>
    %cst_59 = arith.constant dense<0.000000e+00> : vector<16x32xf32>
    %171 = tpu.matmul %169, %170, %cst_59 {dimension_numbers = #tpu.dot_dimension_numbers<[1], [0], [0], [1], [0, 0, 1, 1], [], []>} : vector<16x32xf32>, vector<32x32xf32>, vector<16x32xf32> -> vector<16x32xf32>
    %172 = math.tanh %171 : vector<16x32xf32>
    %c0_60 = arith.constant 0 : index
    %c0_61 = arith.constant 0 : index
    %173 = vector.load %arg6[%c0_60, %c0_61] : memref<32x1xf32, #tpu.memory_space<vmem>>, vector<32x1xf32>
    %cst_62 = arith.constant dense<0.000000e+00> : vector<16x1xf32>
    %174 = tpu.matmul %172, %173, %cst_62 {dimension_numbers = #tpu.dot_dimension_numbers<[1], [0], [0], [1], [0, 0, 1, 1], [], []>} : vector<16x32xf32>, vector<32x1xf32>, vector<16x1xf32> -> vector<16x1xf32>
    %175 = tpu.iota {dimensions = array<i32: 0>} : vector<16x2xi32>
    %176 = tpu.iota {dimensions = array<i32: 1>} : vector<16x2xi32>
    %c1_i32 = arith.constant 1 : i32
    %177 = vector.broadcast %c1_i32 : i32 to vector<16x2xi32>
    %178 = arith.andi %175, %177 : vector<16x2xi32>
    %179 = arith.cmpi eq, %178, %176 : vector<16x2xi32>
    %cst_63 = arith.constant -1.000000e+30 : f32
    %180 = vector.shape_cast %174 : vector<16x1xf32> to vector<16x1xf32>
    %181 = vector.broadcast %180 : vector<16x1xf32> to vector<16x2xf32>
    %182 = vector.broadcast %cst_63 : f32 to vector<16x2xf32>
    %183 = arith.select %179, %181, %182 : vector<16x2xi1>, vector<16x2xf32>
    %cst_64 = arith.constant dense<0xFF800000> : vector<2xf32>
    %184 = vector.multi_reduction <maximumf>, %183, %cst_64 [0] : vector<16x2xf32> to vector<2xf32>
    %185 = vector.shape_cast %184 : vector<2xf32> to vector<1x2xf32>
    %186 = vector.broadcast %185 : vector<1x2xf32> to vector<16x2xf32>
    %187 = arith.subf %183, %186 : vector<16x2xf32>
    %188 = math.exp %187 : vector<16x2xf32>
    %cst_65 = arith.constant dense<0.000000e+00> : vector<2xf32>
    %189 = vector.multi_reduction <add>, %188, %cst_65 [0] : vector<16x2xf32> to vector<2xf32>
    %190 = vector.shape_cast %189 : vector<2xf32> to vector<1x2xf32>
    %191 = tpu.reciprocal %190 : vector<1x2xf32> -> vector<1x2xf32>
    %192 = vector.broadcast %191 : vector<1x2xf32> to vector<16x2xf32>
    %193 = arith.mulf %188, %192 : vector<16x2xf32>
    %cst_66 = arith.constant dense<0.000000e+00> : vector<16xf32>
    %194 = vector.multi_reduction <add>, %193, %cst_66 [1] : vector<16x2xf32> to vector<16xf32>
    %195 = vector.shape_cast %194 : vector<16xf32> to vector<16x1xf32>
    %196 = tpu.iota {dimensions = array<i32: 1>} : vector<2x16xi32>
    %197 = tpu.iota {dimensions = array<i32: 0>} : vector<2x16xi32>
    %c1_i32_67 = arith.constant 1 : i32
    %198 = vector.broadcast %c1_i32_67 : i32 to vector<2x16xi32>
    %199 = arith.andi %196, %198 : vector<2x16xi32>
    %200 = arith.cmpi eq, %199, %197 : vector<2x16xi32>
    %201 = arith.extui %200 : vector<2x16xi1> to vector<2x16xi32>
    %202 = arith.sitofp %201 : vector<2x16xi32> to vector<2x16xf32>
    %203 = vector.broadcast %195 : vector<16x1xf32> to vector<16x32xf32>
    %204 = arith.mulf %169, %203 : vector<16x32xf32>
    %cst_68 = arith.constant dense<0.000000e+00> : vector<2x32xf32>
    %205 = tpu.matmul %202, %204, %cst_68 {dimension_numbers = #tpu.dot_dimension_numbers<[1], [0], [0], [1], [0, 0, 1, 1], [], []>} : vector<2x16xf32>, vector<16x32xf32>, vector<2x32xf32> -> vector<2x32xf32>
    %c0_69 = arith.constant 0 : index
    %c0_70 = arith.constant 0 : index
    %206 = vector.load %arg7[%c0_69, %c0_70] : memref<32x16xf32, #tpu.memory_space<vmem>>, vector<32x16xf32>
    %cst_71 = arith.constant dense<0.000000e+00> : vector<2x16xf32>
    %207 = tpu.matmul %205, %206, %cst_71 {dimension_numbers = #tpu.dot_dimension_numbers<[1], [0], [0], [1], [0, 0, 1, 1], [], []>} : vector<2x32xf32>, vector<32x16xf32>, vector<2x16xf32> -> vector<2x16xf32>
    %c0_72 = arith.constant 0 : index
    %c0_73 = arith.constant 0 : index
    %208 = vector.load %arg8[%c0_72, %c0_73] : memref<1x16xf32, #tpu.memory_space<vmem>>, vector<1x16xf32>
    %209 = vector.broadcast %208 : vector<1x16xf32> to vector<2x16xf32>
    %210 = arith.addf %207, %209 : vector<2x16xf32>
    %cst_74 = arith.constant 0.000000e+00 : f32
    %211 = vector.broadcast %cst_74 : f32 to vector<2x16xf32>
    %212 = arith.maximumf %210, %211 : vector<2x16xf32>
    %c0_75 = arith.constant 0 : index
    %c0_76 = arith.constant 0 : index
    %213 = vector.load %arg9[%c0_75, %c0_76] : memref<16x1xf32, #tpu.memory_space<vmem>>, vector<16x1xf32>
    %cst_77 = arith.constant dense<0.000000e+00> : vector<2x1xf32>
    %214 = tpu.matmul %212, %213, %cst_77 {dimension_numbers = #tpu.dot_dimension_numbers<[1], [0], [0], [1], [0, 0, 1, 1], [], []>} : vector<2x16xf32>, vector<16x1xf32>, vector<2x1xf32> -> vector<2x1xf32>
    %c0_78 = arith.constant 0 : index
    %c0_79 = arith.constant 0 : index
    %215 = vector.load %arg10[%c0_78, %c0_79] : memref<1x1xf32, #tpu.memory_space<vmem>>, vector<1x1xf32>
    %216 = vector.broadcast %215 : vector<1x1xf32> to vector<2x1xf32>
    %217 = arith.addf %214, %216 : vector<2x1xf32>
    %218 = arith.negf %217 : vector<2x1xf32>
    %219 = math.exp %218 : vector<2x1xf32>
    %cst_80 = arith.constant 1.000000e+00 : f32
    %220 = vector.broadcast %cst_80 : f32 to vector<2x1xf32>
    %221 = arith.addf %220, %219 : vector<2x1xf32>
    %222 = arith.divf %220, %221 : vector<2x1xf32>
    %c0_81 = arith.constant 0 : index
    %c0_82 = arith.constant 0 : index
    %223 = vector.load %arg11[%c0_81, %c0_82] : memref<2x1xf32, #tpu.memory_space<vmem>>, vector<2x1xf32>
    tpu.vector_store %arg11[%c0_81, %c0_82], %222 {strides = array<i32>} : memref<2x1xf32, #tpu.memory_space<vmem>>, vector<2x1xf32>,
    return
  }
}

</mosaic_0001>

<bundles_post_ra>
// kernel: lstm_attention_pallas.1
= control target key start
LH: loop header
LB: loop body
LE: loop exit
PB: predicated region body
PF: predicated region fallthrough
CT: control target
= control target key end

     0   :  { %v2017_v0 = vmov 0   ;;  %vm70_vm0 = vcmask 1041408   ;;  %v40_v19 = vlaneseq  ;;  %vm63_vm1 = vcmask 408576   ;;  %s2021_s30 = smov 64   ;;  %s2333_s0 = inlined_call_operand.vmem [shape: s32[16,1], index: 0, kind: input, shape index: {}]   ;;  %s2334_s1 = inlined_call_operand.vmem [shape: f32[50,32], index: 1, kind: input, shape index: {}]   ;;  %s2335_s2 = inlined_call_operand.vmem [shape: f32[32,128], index: 2, kind: input, shape index: {}]   ;;  %s2336_s3 = inlined_call_operand.vmem [shape: f32[32,128], index: 3, kind: input, shape index: {}]   ;;  %s2337_s4 = inlined_call_operand.vmem [shape: f32[1,128], index: 4, kind: input, shape index: {}]   ;;  %s2338_s5 = inlined_call_operand.vmem [shape: f32[32,32], index: 5, kind: input, shape index: {}]   ;;  %s2339_s6 = inlined_call_operand.vmem [shape: f32[32,1], index: 6, kind: input, shape index: {}]   ;;  %s2340_s7 = inlined_call_operand.vmem [shape: f32[32,16], index: 7, kind: input, shape index: {}]   ;;  %s2341_s9 = inlined_call_operand.vmem [shape: f32[16,1], index: 9, kind: input, shape index: {}]   ;;  %s2342_s10 = inlined_call_operand.<no memory space> [shape: f32[1,1], index: 10, kind: input, shape index: {}]   ;;  %s2343_s8 = inlined_call_operand.vmem [shape: f32[1,16], index: 8, kind: input, shape index: {}]   ;;  %s2344_s11 = inlined_call_operand.vmem [shape: f32[2,1], index: 11, kind: output, shape index: {}]  }
   0x1   :  { %1937 = vset.pattern.permute.xlu0 %v2017_v0  ;;  %v42_v1 = vld [vmem:[%s2333_s0] sm:$0xff]  ;;  %1938 = vset.pattern.permute.xlu1 %v2017_v0  ;;  %v57_v3 = vld [vmem:[%s2334_s1 + $0x8] sm:$0xff]  ;;  %v58_v4 = vld [vmem:[%s2334_s1 + $0x10] sm:$0xff]  ;;  %v2018_v22 = vmov 0.0   ;;  %v2019_v28 = vmov 0.0|0.0   ;;  %vm2020_vm4 = vmmov 0  }
   0x2   :  { %v56_v2 = vld [vmem:[%s2334_s1] sm:$0xff]  ;;  %45 = vperm.xlu0 %1937, %v42_v1   ;;  %v59_v5 = vld [vmem:[%s2334_s1 + $0x18] sm:$0xff]  ;;  %v43_v6 = vld [vmem:[%s2333_s0 + $0x8] sm:$0xff]  ;;  %v2123_v20 = vand.u32 127, %v40_v19  ;;  %vm160_vm5 = vcmask 261120   ;;  %vm351_vm6 = vcmask 254976  }
   0x3   :  { %v1835_v7 = vpack.c.bf16 %v57_v3, %v56_v2  ;;  %v1839_v8 = vpack.c.bf16 %v59_v5, %v58_v4  ;;  %v60_v9 = vld [vmem:[%s2334_s1 + $0x20] sm:$0xff]  ;;  %v61_v10 = vld [vmem:[%s2334_s1 + $0x28] sm:$0xff]  ;;  %v151_v14 = vld [vmem:[%s2335_s2 + $0x10] sm:$0xff]  ;;  %vm1267_vm8 = vcmask 15360   ;;  %vm1307_vm11 = vcmask 130048  }
   0x4   :  { %v1843_v11 = vpack.c.bf16 %v61_v10, %v60_v9  ;;  %v149_v12 = vld [vmem:[%s2335_s2] sm:$0xff]  ;;  %v150_v13 = vld [vmem:[%s2335_s2 + $0x8] sm:$0xff]  ;;  %v152_v16 = vld [vmem:[%s2335_s2 + $0x18] sm:$0xff]  ;;  %vm1554_vm12 = vcmask 1024  }
   0x5   :  { %1836 = vmatprep.subr.bf16.mxu0 %v1835_v7  ;;  %v1847_v15 = vpack.c.bf16 %v150_v13, %v149_v12  ;;  %v1851_v17 = vpack.c.bf16 %v152_v16, %v151_v14  ;;  %v62_v18 = vld [vmem:[%s2334_s1 + $0x30] sm:$0x3]  ;;  %v244_v26 = vld [vmem:[%s2336_s3] sm:$0xff]  ;;  %v245_v27 = vld [vmem:[%s2336_s3 + $0x8] sm:$0xff] }
   0x6   :  { %48 = vperm.xlu0 %1937, %v43_v6   ;;  %1838 = vmatpush3.bf16.msra.mxu0 %v1835_v7  ;;  %v2136_v29 = vpack.c.bf16 %v245_v27, %v244_v26  ;;  %v246_v30 = vld [vmem:[%s2336_s3 + $0x10] sm:$0xff]  ;;  %v247_v31 = vld [vmem:[%s2336_s3 + $0x18] sm:$0xff]  ;;  %v1565_v35 = vld [vmem:[%s2337_s4] ss:$0 sm:$0xff]  ;;  %s2022_s4 = smov 32  }
   0x7   :  { %1840 = vmatprep.subr.bf16.mxu0 %v1839_v8  ;;  %1848 = vmatprep.subr.bf16.mxu1 %v1847_v15  ;;  %v2147_v32 = vpack.c.bf16 %v247_v31, %v246_v30 }
   0x8   :  { %1850 = vmatpush3.bf16.msra.mxu1 %v1847_v15 }
   0x9   :  { %1852 = vmatprep.subr.bf16.mxu1 %v1851_v17 }
   0xa   :  { %1842 = vmatpush3.bf16.msra.mxu0 %v1839_v8 }
   0xb   :  { %1844 = vmatprep.subr.bf16.mxu0 %v1843_v11 }
   0xc   :  { %1854 = vmatpush3.bf16.msra.mxu1 %v1851_v17 }
   0xd   :  { %1855 = vmatprep.subr.bf16.mxu1 %v2019_v28 }
   0xe   :  { %1846 = vmatpush3.bf16.msra.mxu0 %v1843_v11 }
   0xf   :  { %1684 = vmatprep.subr.msk.mxu0 %vm70_vm0, %v62_v18 }
  0x12   :  { %1685 = vmatpush3.msk.msra.mxu0 %vm70_vm0, %v62_v18 }
  0x13   :  { %1861 = vmatprep.subr.bf16.mxu0 %v2019_v28 }
  0x81   :  { %v46_v21 = vpop.permute.xlu0 %45 }
  0x82   :  { %vm50_vm2 = vcmp.eq.s32.totalorder %v46_v21, %v2123_v20 }
  0x83   :  { %v1560_v23 = vsel %vm50_vm2, 1.0, %v2018_v22 }
  0x84   :  { %1686 = vmatprep.mubr.msk.f32.mxu0 %vm63_vm1, %v1560_v23 }
  0x85   :  { %v49_v24 = vpop.permute.xlu0 %48 }
  0x86   :  { %vm51_vm3 = vcmp.eq.s32.totalorder %v49_v24, %v2123_v20 }
  0x87   :  { %v1561_v25 = vsel %vm51_vm3, 1.0, %v2018_v22 }
  0x88   :  { %1687 = vmatmul.mubr.msk.f32.vlgmr.msra.gmra.mrb[0].mxu0 %vm63_vm1, %v1561_v25 }
  0x89   :  { %1863 = vmatpush3.bf16.msra.mxu0 %v2136_v29  ;;  %1719 = vmatprep.mubr.msk.f32.mxu0 %vm2020_vm4, %v2018_v22 }
  0x8a   :  { %1864 = vmatprep.subr.bf16.mxu0 %v2019_v28 }
  0x8d   :  { %1866 = vmatpush3.bf16.msra.mxu0 %v2147_v32 }
  0x8e   :  { %1873 = vmatprep.subr.bf16.mxu0 %v2019_v28 }
 0x15b   :  { %v1688_v33 = vpop.f32.mrb[0].mxu0 }
 0x15c   :  { %v140_v34 = vpop.f32.mrb[1].mxu0 }
 0x15d   :  { %1697 = vmatprep.mubr.msk.f32.mxu1 %vm160_vm5, %v140_v34 }
 0x15e   :  { %1698 = vmatmul.mubr.msk.f32.vlgmr.msra.gmra.mrb[0].mxu1 %vm160_vm5, %v1688_v33 }
 0x15f   :  { %1857 = vmatpush3.bf16.msra.mxu1 %v2136_v29  ;;  %1708 = vmatprep.mubr.msk.f32.mxu1 %vm2020_vm4, %v2018_v22 }
 0x160   :  { %1858 = vmatprep.subr.bf16.mxu1 %v2019_v28 }
 0x163   :  { %1860 = vmatpush3.bf16.msra.mxu1 %v2147_v32 }
 0x164   :  { %1867 = vmatprep.subr.bf16.mxu1 %v2019_v28 }
 0x166   :  { %1709 = vmatmul.mubr.f32.vlgmr.msra.gmra.mrb[2].mxu1 %v2018_v22 }
 0x167   :  { %1869 = vmatpush3.bf16.msra.mxu1 %v2136_v29  ;;  %1730 = vmatprep.mubr.msk.f32.mxu1 %vm2020_vm4, %v2018_v22 }
 0x168   :  { %1870 = vmatprep.subr.bf16.mxu1 %v2019_v28 }
 0x16b   :  { %1872 = vmatpush3.bf16.msra.mxu1 %v2147_v32 }
 0x16c   :  { %1879 = vmatprep.subr.bf16.mxu1 %v2019_v28 }
 0x231   :  { %v1699_v36 = vpop.f32.mrb[0].mxu1 }
 0x232   :  { %v239_v37 = vadd.f32 %v1699_v36, %v1565_v35  ;;  %v233_v38 = vpop.f32.mrb[1].mxu1 }
 0x233   :  { %v234_v39 = vadd.f32 %v1565_v35, %v233_v38 }
 0x234   :  { %243 = vst [vmem:[#allocation2 + $0x8] sm:$0xff] %v239_v37 }
 0x235   :  { %242 = vst [vmem:[#allocation2] sm:$0xff] %v234_v39 }
 0x239   :  { %v318_v40 = vpop.f32.mrb[2].mxu1 }
 0x23a   :  { %v1710_v41 = vpop.f32.mrb[3].mxu1 }
 0x23c   :  { %v248_v42 = vld [vmem:[#allocation2] sm:$0x3]  ;;  %v353_v58 = vld [vmem:[#allocation2 + $0x2] sm:$0x3]  ;;  %v456_v12 = vld [vmem:[#allocation2 + $0x4] sm:$0x3] }
 0x23d   :  { %v322_v43 = vadd.f32 %v318_v40, %v248_v42  ;;  %v559_v36 = vld [vmem:[#allocation2 + $0x6] sm:$0x3] }
 0x23f   :  { %1939 = vtanh.f32 %v322_v43  ;;  %v1568_v45 = vmul.f32 -1.442695, %v322_v43 }
 0x241   :  { %1941 = vpow2.f32 %v1568_v45 }
 0x249   :  { %v1940_v44 = vpop.eup %1939 }
 0x24a   :  { %332 = vrot.lane.b32.xlu1 %v1940_v44, %s2021_s30 }
 0x24b   :  { %v1942_v46 = vpop.eup %1941 }
 0x24c   :  { %v326_v47 = vadd.f32 1.0, %v1942_v46 }
 0x24e   :  { %1943 = vrcp.f32 %v326_v47 }
 0x258   :  { %v1944_v48 = vpop.eup %1943 }
 0x259   :  { %v330_v51 = vmul.f32 0.0, %v1944_v48 }
 0x2bc   :  { %v333_v49 = vpop.permute.xlu1 %332 }
 0x2bd   :  { %v335_v50 = vmul.f32 %v1944_v48, %v333_v49 }
 0x2bf   :  { %337 = vrot.lane.b32.xlu1 %v335_v50, %s2022_s4 }
 0x331   :  { %v338_v52 = vpop.permute.xlu1 %337 }
 0x332   :  { %v340_v53 = vadd.f32 %v338_v52, %v330_v51 }
 0x334   :  { %1945 = vtanh.f32 %v340_v53 }
 0x33e   :  { %v1946_v54 = vpop.eup %1945 }
 0x33f   :  { %343 = vrot.lane.b32.xlu0 %v1946_v54, %s2021_s30  ;;  %v662_v54 = vld [vmem:[#allocation2 + $0x8] sm:$0x3] }
 0x3b1   :  { %v344_v55 = vpop.permute.xlu0 %343 }
 0x3b2   :  { %v346_v56 = vmul.f32 %v1944_v48, %v344_v55 }
 0x3b4   :  { %348 = vrot.lane.b32.xlu1 %v346_v56, %s2022_s4 }
 0x426   :  { %v349_v57 = vpop.permute.xlu1 %348 }
 0x427   :  { %352 = vst.msk [vmem:[#allocation3] sm:$0x3] %vm351_vm6, %v349_v57  ;;  %1720 = vmatmul.mubr.msk.f32.vlgmr.msra.gmra.mrb[2].mxu0 %vm160_vm5, %v349_v57 }
 0x428   :  { %1875 = vmatpush3.bf16.msra.mxu0 %v2136_v29  ;;  %1741 = vmatprep.mubr.msk.f32.mxu0 %vm2020_vm4, %v2018_v22 }
 0x429   :  { %1876 = vmatprep.subr.bf16.mxu0 %v2019_v28 }
 0x42c   :  { %1878 = vmatpush3.bf16.msra.mxu0 %v2147_v32 }
 0x42d   :  { %1885 = vmatprep.subr.bf16.mxu0 %v2019_v28 }
 0x4fa   :  { %v422_v59 = vpop.f32.mrb[2].mxu0 }
 0x4fb   :  { %v426_v60 = vadd.f32 %v422_v59, %v353_v58  ;;  %v1721_v61 = vpop.f32.mrb[3].mxu0 }
 0x4fd   :  { %1947 = vtanh.f32 %v426_v60  ;;  %v1570_v63 = vmul.f32 -1.442695, %v426_v60 }
 0x4ff   :  { %1949 = vpow2.f32 %v1570_v63 }
 0x507   :  { %v1948_v62 = vpop.eup %1947 }
 0x508   :  { %436 = vrot.lane.b32.xlu0 %v1948_v62, %s2021_s30 }
 0x509   :  { %v1950_v0 = vpop.eup %1949 }
 0x50a   :  { %v430_v1 = vadd.f32 1.0, %v1950_v0 }
 0x50c   :  { %1951 = vrcp.f32 %v430_v1 }
 0x516   :  { %v1952_v2 = vpop.eup %1951 }
 0x517   :  { %v434_v5 = vmul.f32 %v1952_v2, %v340_v53 }
 0x57a   :  { %v437_v3 = vpop.permute.xlu0 %436 }
 0x57b   :  { %v439_v4 = vmul.f32 %v1952_v2, %v437_v3 }
 0x57d   :  { %441 = vrot.lane.b32.xlu1 %v439_v4, %s2022_s4 }
 0x5ef   :  { %v442_v6 = vpop.permute.xlu1 %441 }
 0x5f0   :  { %v444_v7 = vadd.f32 %v442_v6, %v434_v5 }
 0x5f2   :  { %1953 = vtanh.f32 %v444_v7 }
 0x5fc   :  { %v1954_v8 = vpop.eup %1953 }
 0x5fd   :  { %447 = vrot.lane.b32.xlu0 %v1954_v8, %s2021_s30  ;;  %v765_v8 = vld [vmem:[#allocation2 + $0xa] sm:$0x3] }
 0x66f   :  { %v448_v9 = vpop.permute.xlu0 %447 }
 0x670   :  { %v450_v10 = vmul.f32 %v1952_v2, %v448_v9 }
 0x672   :  { %452 = vrot.lane.b32.xlu1 %v450_v10, %s2022_s4 }
 0x6e4   :  { %v453_v11 = vpop.permute.xlu1 %452 }
 0x6e5   :  { %455 = vst.msk [vmem:[#allocation3 + $0x2] sm:$0x3] %vm351_vm6, %v453_v11  ;;  %1731 = vmatmul.mubr.msk.f32.vlgmr.msra.gmra.mrb[4].mxu1 %vm160_vm5, %v453_v11 }
 0x6e6   :  { %1881 = vmatpush3.bf16.msra.mxu1 %v2136_v29  ;;  %1752 = vmatprep.mubr.msk.f32.mxu1 %vm2020_vm4, %v2018_v22 }
 0x6e7   :  { %1882 = vmatprep.subr.bf16.mxu1 %v2019_v28 }
 0x6ea   :  { %1884 = vmatpush3.bf16.msra.mxu1 %v2147_v32 }
 0x6eb   :  { %1891 = vmatprep.subr.bf16.mxu1 %v2019_v28 }
 0x7b8   :  { %v525_v13 = vpop.f32.mrb[4].mxu1 }
 0x7b9   :  { %v529_v14 = vadd.f32 %v525_v13, %v456_v12  ;;  %v1732_v15 = vpop.f32.mrb[5].mxu1 }
 0x7bb   :  { %1955 = vtanh.f32 %v529_v14  ;;  %v1572_v17 = vmul.f32 -1.442695, %v529_v14 }
 0x7bd   :  { %1957 = vpow2.f32 %v1572_v17 }
 0x7c5   :  { %v1956_v16 = vpop.eup %1955 }
 0x7c6   :  { %539 = vrot.lane.b32.xlu0 %v1956_v16, %s2021_s30 }
 0x7c7   :  { %v1958_v18 = vpop.eup %1957 }
 0x7c8   :  { %v533_v21 = vadd.f32 1.0, %v1958_v18 }
 0x7ca   :  { %1959 = vrcp.f32 %v533_v21 }
 0x7d4   :  { %v1960_v23 = vpop.eup %1959 }
 0x7d5   :  { %v537_v26 = vmul.f32 %v1960_v23, %v444_v7 }
 0x838   :  { %v540_v24 = vpop.permute.xlu0 %539 }
 0x839   :  { %v542_v25 = vmul.f32 %v1960_v23, %v540_v24 }
 0x83b   :  { %544 = vrot.lane.b32.xlu1 %v542_v25, %s2022_s4 }
 0x8ad   :  { %v545_v27 = vpop.permute.xlu1 %544 }
 0x8ae   :  { %v547_v30 = vadd.f32 %v545_v27, %v537_v26 }
 0x8b0   :  { %1961 = vtanh.f32 %v547_v30 }
 0x8ba   :  { %v1962_v31 = vpop.eup %1961 }
 0x8bb   :  { %550 = vrot.lane.b32.xlu0 %v1962_v31, %s2021_s30 }
 0x92d   :  { %v551_v33 = vpop.permute.xlu0 %550 }
 0x92e   :  { %v553_v34 = vmul.f32 %v1960_v23, %v551_v33 }
 0x930   :  { %555 = vrot.lane.b32.xlu1 %v553_v34, %s2022_s4 }
 0x9a2   :  { %v556_v35 = vpop.permute.xlu1 %555 }
 0x9a3   :  { %558 = vst.msk [vmem:[#allocation3 + $0x4] sm:$0x3] %vm351_vm6, %v556_v35  ;;  %1742 = vmatmul.mubr.msk.f32.vlgmr.msra.gmra.mrb[4].mxu0 %vm160_vm5, %v556_v35 }
 0x9a4   :  { %1887 = vmatpush3.bf16.msra.mxu0 %v2136_v29  ;;  %1763 = vmatprep.mubr.msk.f32.mxu0 %vm2020_vm4, %v2018_v22 }
 0x9a5   :  { %1888 = vmatprep.subr.bf16.mxu0 %v2019_v28 }
 0x9a8   :  { %1890 = vmatpush3.bf16.msra.mxu0 %v2147_v32 }
 0x9a9   :  { %1897 = vmatprep.subr.bf16.mxu0 %v2019_v28 }
 0xa76   :  { %v628_v37 = vpop.f32.mrb[4].mxu0 }
 0xa77   :  { %v632_v38 = vadd.f32 %v628_v37, %v559_v36  ;;  %v1743_v39 = vpop.f32.mrb[5].mxu0 }
 0xa79   :  { %1963 = vtanh.f32 %v632_v38  ;;  %v1574_v41 = vmul.f32 -1.442695, %v632_v38 }
 0xa7b   :  { %1965 = vpow2.f32 %v1574_v41 }
 0xa83   :  { %v1964_v40 = vpop.eup %1963 }
 0xa84   :  { %642 = vrot.lane.b32.xlu0 %v1964_v40, %s2021_s30 }
 0xa85   :  { %v1966_v42 = vpop.eup %1965 }
 0xa86   :  { %v636_v43 = vadd.f32 1.0, %v1966_v42 }
 0xa88   :  { %1967 = vrcp.f32 %v636_v43 }
 0xa92   :  { %v1968_v44 = vpop.eup %1967 }
 0xa93   :  { %v640_v47 = vmul.f32 %v1968_v44, %v547_v30  ;;  %v868_v30 = vld [vmem:[#allocation2 + $0xc] sm:$0x3] }
 0xaf6   :  { %v643_v45 = vpop.permute.xlu0 %642 }
 0xaf7   :  { %v645_v46 = vmul.f32 %v1968_v44, %v643_v45 }
 0xaf9   :  { %647 = vrot.lane.b32.xlu1 %v645_v46, %s2022_s4 }
 0xb6b   :  { %v648_v48 = vpop.permute.xlu1 %647 }
 0xb6c   :  { %v650_v49 = vadd.f32 %v648_v48, %v640_v47 }
 0xb6e   :  { %1969 = vtanh.f32 %v650_v49 }
 0xb78   :  { %v1970_v50 = vpop.eup %1969 }
 0xb79   :  { %653 = vrot.lane.b32.xlu0 %v1970_v50, %s2021_s30 }
 0xbeb   :  { %v654_v51 = vpop.permute.xlu0 %653 }
 0xbec   :  { %v656_v52 = vmul.f32 %v1968_v44, %v654_v51 }
 0xbee   :  { %658 = vrot.lane.b32.xlu1 %v656_v52, %s2022_s4 }
 0xc60   :  { %v659_v53 = vpop.permute.xlu1 %658 }
 0xc61   :  { %661 = vst.msk [vmem:[#allocation3 + $0x6] sm:$0x3] %vm351_vm6, %v659_v53  ;;  %1753 = vmatmul.mubr.msk.f32.vlgmr.msra.gmra.mrb[6].mxu1 %vm160_vm5, %v659_v53 }
 0xc62   :  { %1893 = vmatpush3.bf16.msra.mxu1 %v2136_v29  ;;  %1774 = vmatprep.mubr.msk.f32.mxu1 %vm2020_vm4, %v2018_v22 }
 0xc63   :  { %1894 = vmatprep.subr.bf16.mxu1 %v2019_v28 }
 0xc66   :  { %1896 = vmatpush3.bf16.msra.mxu1 %v2147_v32 }
 0xc68   :  { %v2235_v27 = vld [vmem:[#allocation3] sm:$0xff] }
 0xd34   :  { %v731_v55 = vpop.f32.mrb[6].mxu1 }
 0xd35   :  { %v735_v56 = vadd.f32 %v731_v55, %v662_v54  ;;  %v1754_v57 = vpop.f32.mrb[7].mxu1 }
 0xd37   :  { %1971 = vtanh.f32 %v735_v56  ;;  %v1576_v59 = vmul.f32 -1.442695, %v735_v56 }
 0xd39   :  { %1973 = vpow2.f32 %v1576_v59 }
 0xd41   :  { %v1972_v58 = vpop.eup %1971 }
 0xd42   :  { %745 = vrot.lane.b32.xlu0 %v1972_v58, %s2021_s30 }
 0xd43   :  { %v1974_v60 = vpop.eup %1973 }
 0xd44   :  { %v739_v61 = vadd.f32 1.0, %v1974_v60 }
 0xd46   :  { %1975 = vrcp.f32 %v739_v61 }
 0xd50   :  { %v1976_v62 = vpop.eup %1975 }
 0xd51   :  { %v743_v1 = vmul.f32 %v1976_v62, %v650_v49  ;;  %v971_v49 = vld [vmem:[#allocation2 + $0xe] sm:$0x3] }
 0xdb4   :  { %v746_v63 = vpop.permute.xlu0 %745 }
 0xdb5   :  { %v748_v0 = vmul.f32 %v1976_v62, %v746_v63 }
 0xdb7   :  { %750 = vrot.lane.b32.xlu1 %v748_v0, %s2022_s4  ;;  %v1076_v0 = vld [vmem:[%s2338_s5] sm:$0xff] }
 0xe29   :  { %v751_v2 = vpop.permute.xlu1 %750 }
 0xe2a   :  { %v753_v3 = vadd.f32 %v751_v2, %v743_v1  ;;  %v1077_v1 = vld [vmem:[%s2338_s5 + $0x8] sm:$0xff] }
 0xe2b   :  { %v1903_v2 = vpack.c.bf16 %v1077_v1, %v1076_v0 }
 0xe2c   :  { %1977 = vtanh.f32 %v753_v3 }
 0xe2d   :  { %1904 = vmatprep.subr.bf16.mxu1 %v1903_v2 }
 0xe36   :  { %v1978_v4 = vpop.eup %1977 }
 0xe37   :  { %756 = vrot.lane.b32.xlu0 %v1978_v4, %s2021_s30  ;;  %v1079_v4 = vld [vmem:[%s2338_s5 + $0x18] sm:$0xff] }
 0xea9   :  { %v757_v5 = vpop.permute.xlu0 %756 }
 0xeaa   :  { %v759_v6 = vmul.f32 %v1976_v62, %v757_v5 }
 0xeac   :  { %761 = vrot.lane.b32.xlu1 %v759_v6, %s2022_s4 }
 0xf1e   :  { %v762_v7 = vpop.permute.xlu1 %761 }
 0xf1f   :  { %764 = vst.msk [vmem:[#allocation3 + $0x8] sm:$0x3] %vm351_vm6, %v762_v7  ;;  %1764 = vmatmul.mubr.msk.f32.vlgmr.msra.gmra.mrb[6].mxu0 %vm160_vm5, %v762_v7 }
 0xf20   :  { %1899 = vmatpush3.bf16.msra.mxu0 %v2136_v29  ;;  %1785 = vmatprep.mubr.msk.f32.mxu0 %vm2020_vm4, %v2018_v22 }
 0xf21   :  { %1900 = vmatprep.subr.bf16.mxu0 %v2019_v28 }
 0xf24   :  { %1902 = vmatpush3.bf16.msra.mxu0 %v2147_v32 }
 0xff2   :  { %v834_v9 = vpop.f32.mrb[6].mxu0 }
 0xff3   :  { %v838_v10 = vadd.f32 %v834_v9, %v765_v8  ;;  %v1765_v11 = vpop.f32.mrb[7].mxu0 }
 0xff4   :  { %v1164_v11 = vld [vmem:[%s2339_s6 + $0x8] sm:$0xff] }
 0xff5   :  { %1979 = vtanh.f32 %v838_v10  ;;  %v1578_v13 = vmul.f32 -1.442695, %v838_v10  ;;  %v1163_v10 = vld [vmem:[%s2339_s6] sm:$0xff] }
 0xff7   :  { %1981 = vpow2.f32 %v1578_v13  ;;  %v1911_v13 = vpack.c.bf16 %v1164_v11, %v1163_v10 }
 0xff9   :  { %1912 = vmatprep.subr.bf16.mxu0 %v1911_v13 }
 0xfff   :  { %v1980_v12 = vpop.eup %1979 }
0x1000   :  { %848 = vrot.lane.b32.xlu0 %v1980_v12, %s2021_s30  ;;  %v1165_v12 = vld [vmem:[%s2339_s6 + $0x10] sm:$0xff] }
0x1001   :  { %v1982_v14 = vpop.eup %1981 }
0x1002   :  { %v842_v15 = vadd.f32 1.0, %v1982_v14  ;;  %v1166_v14 = vld [vmem:[%s2339_s6 + $0x18] sm:$0xff] }
0x1004   :  { %1983 = vrcp.f32 %v842_v15  ;;  %v1915_v15 = vpack.c.bf16 %v1166_v14, %v1165_v12  ;;  %v1466_v12 = vld [vmem:[%s2341_s9] sm:$0xff] }
0x100e   :  { %v1984_v29 = vpop.eup %1983 }
0x100f   :  { %v846_v18 = vmul.f32 %v1984_v29, %v753_v3  ;;  %v1078_v3 = vld [vmem:[%s2338_s5 + $0x10] sm:$0xff] }
0x1010   :  { %v1907_v5 = vpack.c.bf16 %v1079_v4, %v1078_v3  ;;  %v1381_v4 = vld [vmem:[%s2340_s7] sm:$0xff] }
0x1072   :  { %v849_v16 = vpop.permute.xlu0 %848 }
0x1073   :  { %v851_v17 = vmul.f32 %v1984_v29, %v849_v16 }
0x1075   :  { %853 = vrot.lane.b32.xlu1 %v851_v17, %s2022_s4 }
0x10e7   :  { %v854_v32 = vpop.permute.xlu1 %853 }
0x10e8   :  { %v856_v21 = vadd.f32 %v854_v32, %v846_v18 }
0x10ea   :  { %1985 = vtanh.f32 %v856_v21 }
0x10f4   :  { %v1986_v23 = vpop.eup %1985 }
0x10f5   :  { %859 = vrot.lane.b32.xlu0 %v1986_v23, %s2021_s30  ;;  %v1249_v23 = vshrl.u32 %v40_v19, 7 }
0x1167   :  { %v860_v24 = vpop.permute.xlu0 %859 }
0x1168   :  { %v862_v25 = vmul.f32 %v1984_v29, %v860_v24  ;;  %v1250_v24 = vadd.s32 8, %v1249_v23 }
0x116a   :  { %864 = vrot.lane.b32.xlu1 %v862_v25, %s2022_s4  ;;  %v1252_v25 = vand.u32 1, %v1250_v24 }
0x116c   :  { %vm1254_vm7 = vcmp.eq.s32.totalorder %v1252_v25, %v2123_v20 }
0x11dc   :  { %v865_v26 = vpop.permute.xlu1 %864 }
0x11dd   :  { %867 = vst.msk [vmem:[#allocation3 + $0xa] sm:$0x3] %vm351_vm6, %v865_v26  ;;  %1775 = vmatmul.mubr.msk.f32.vlgmr.msra.gmra.mrb[8].mxu1 %vm160_vm5, %v865_v26  ;;  %v1251_v26 = vand.u32 1, %v1249_v23 }
0x11de   :  { %1796 = vmatprep.mubr.msk.f32.mxu1 %vm160_vm5, %v2235_v27  ;;  %1906 = vmatpush3.bf16.msra.mxu1 %v1903_v2 }
0x11df   :  { %1908 = vmatprep.subr.bf16.mxu1 %v1907_v5  ;;  %vm1253_vm9 = vcmp.eq.s32.totalorder %v1251_v26, %v2123_v20 }
0x11e2   :  { %1910 = vmatpush3.bf16.msra.mxu1 %v1907_v5  ;;  %v1382_v5 = vld [vmem:[%s2340_s7 + $0x8] sm:$0xff] }
0x11e3   :  { %1919 = vmatprep.subr.bf16.mxu1 %v2019_v28 }
0x12b0   :  { %v937_v31 = vpop.f32.mrb[8].mxu1 }
0x12b1   :  { %v941_v33 = vadd.f32 %v937_v31, %v868_v30  ;;  %v1776_v34 = vpop.f32.mrb[9].mxu1 }
0x12b3   :  { %1987 = vtanh.f32 %v941_v33  ;;  %v1580_v36 = vmul.f32 -1.442695, %v941_v33 }
0x12b5   :  { %1989 = vpow2.f32 %v1580_v36 }
0x12bd   :  { %v1988_v35 = vpop.eup %1987 }
0x12be   :  { %951 = vrot.lane.b32.xlu0 %v1988_v35, %s2021_s30 }
0x12bf   :  { %v1990_v37 = vpop.eup %1989 }
0x12c0   :  { %v945_v38 = vadd.f32 1.0, %v1990_v37 }
0x12c2   :  { %1991 = vrcp.f32 %v945_v38 }
0x12cc   :  { %v1992_v39 = vpop.eup %1991 }
0x12cd   :  { %v949_v42 = vmul.f32 %v1992_v39, %v856_v21 }
0x1330   :  { %v952_v40 = vpop.permute.xlu0 %951 }
0x1331   :  { %v954_v41 = vmul.f32 %v1992_v39, %v952_v40 }
0x1333   :  { %956 = vrot.lane.b32.xlu1 %v954_v41, %s2022_s4 }
0x13a5   :  { %v957_v43 = vpop.permute.xlu1 %956 }
0x13a6   :  { %v959_v44 = vadd.f32 %v957_v43, %v949_v42 }
0x13a8   :  { %1993 = vtanh.f32 %v959_v44 }
0x13b2   :  { %v1994_v45 = vpop.eup %1993 }
0x13b3   :  { %962 = vrot.lane.b32.xlu0 %v1994_v45, %s2021_s30 }
0x1425   :  { %v963_v46 = vpop.permute.xlu0 %962 }
0x1426   :  { %v965_v47 = vmul.f32 %v1992_v39, %v963_v46 }
0x1428   :  { %967 = vrot.lane.b32.xlu1 %v965_v47, %s2022_s4 }
0x149a   :  { %v968_v48 = vpop.permute.xlu1 %967 }
0x149b   :  { %970 = vst.msk [vmem:[#allocation3 + $0xc] sm:$0x3] %vm351_vm6, %v968_v48  ;;  %1786 = vmatmul.mubr.msk.f32.vlgmr.msra.gmra.mrb[8].mxu0 %vm160_vm5, %v968_v48 }
0x149c   :  { %1914 = vmatpush3.bf16.msra.mxu0 %v1911_v13  ;;  %v1467_v13 = vld [vmem:[%s2341_s9 + $0x8] sm:$0xff] }
0x149d   :  { %1916 = vmatprep.subr.bf16.mxu0 %v1915_v15  ;;  %v1929_v14 = vpack.c.bf16 %v1467_v13, %v1466_v12 }
0x14a0   :  { %1918 = vmatpush3.bf16.msra.mxu0 %v1915_v15 }
0x14a1   :  { %1928 = vmatprep.subr.bf16.mxu0 %v2019_v28 }
0x156e   :  { %v1040_v50 = vpop.f32.mrb[8].mxu0 }
0x156f   :  { %v1044_v51 = vadd.f32 %v1040_v50, %v971_v49  ;;  %v1787_v52 = vpop.f32.mrb[9].mxu0 }
0x1571   :  { %1995 = vtanh.f32 %v1044_v51  ;;  %v1582_v54 = vmul.f32 -1.442695, %v1044_v51 }
0x1573   :  { %1997 = vpow2.f32 %v1582_v54 }
0x157b   :  { %v1996_v53 = vpop.eup %1995 }
0x157c   :  { %1054 = vrot.lane.b32.xlu0 %v1996_v53, %s2021_s30 }
0x157d   :  { %v1998_v55 = vpop.eup %1997 }
0x157e   :  { %v1048_v56 = vadd.f32 1.0, %v1998_v55 }
0x1580   :  { %1999 = vrcp.f32 %v1048_v56 }
0x158a   :  { %v2000_v57 = vpop.eup %1999 }
0x158b   :  { %v1052_v60 = vmul.f32 %v2000_v57, %v959_v44 }
0x15ee   :  { %v1055_v58 = vpop.permute.xlu0 %1054 }
0x15ef   :  { %v1057_v59 = vmul.f32 %v2000_v57, %v1055_v58 }
0x15f1   :  { %1059 = vrot.lane.b32.xlu1 %v1057_v59, %s2022_s4 }
0x1663   :  { %v1060_v61 = vpop.permute.xlu1 %1059 }
0x1664   :  { %v1062_v62 = vadd.f32 %v1060_v61, %v1052_v60 }
0x1666   :  { %2001 = vtanh.f32 %v1062_v62 }
0x1670   :  { %v2002_v63 = vpop.eup %2001 }
0x1671   :  { %1065 = vrot.lane.b32.xlu0 %v2002_v63, %s2021_s30  ;;  %v1301_v63 = vand.u32 1, %v2123_v20  ;;  %v1923_v20 = vpack.c.bf16 %v1382_v5, %v1381_v4 }
0x1673   :  { %vm1302_vm10 = vcmp.eq.s32.totalorder %v1301_v63, %v1249_v23 }
0x16e3   :  { %v1066_v6 = vpop.permute.xlu0 %1065 }
0x16e4   :  { %v1068_v7 = vmul.f32 %v2000_v57, %v1066_v6 }
0x16e6   :  { %1070 = vrot.lane.b32.xlu1 %v1068_v7, %s2022_s4  ;;  %v1587_v7 = vsel %vm1302_vm10, 1.0, %v2018_v22 }
0x1758   :  { %v1071_v8 = vpop.permute.xlu1 %1070 }
0x1759   :  { %1073 = vst.msk [vmem:[#allocation3 + $0xe] sm:$0x3] %vm351_vm6, %v1071_v8  ;;  %v1384_v8 = vld [vmem:[%s2340_s7 + $0x18] sm:$0xff] }
0x1760   :  { %v2263_v9 = vld [vmem:[#allocation3 + $0x8] sm:$0xff] }
0x1761   :  { %1797 = vmatmul.mubr.msk.f32.vlgmr.msra.gmra.mrb[10].mxu1 %vm160_vm5, %v2263_v9 }
0x1762   :  { %1814 = vmatprep.mubr.msk.f32.mxu1 %vm2020_vm4, %v2018_v22 }
0x1834   :  { %v1798_v29 = vpop.f32.mrb[10].mxu1 }
0x1835   :  { %v1152_v16 = vpop.f32.mrb[11].mxu1 }
0x1836   :  { %2003 = vtanh.f32 %v1152_v16 }
0x1837   :  { %2005 = vtanh.f32 %v1798_v29 }
0x1840   :  { %v2004_v17 = vpop.eup %2003 }
0x1841   :  { %v2006_v18 = vpop.eup %2005  ;;  %1807 = vmatprep.mubr.msk.f32.mxu0 %vm160_vm5, %v2004_v17 }
0x1842   :  { %1808 = vmatmul.mubr.msk.f32.vlgmr.msra.gmra.mrb[10].mxu0 %vm160_vm5, %v2006_v18 }
0x1843   :  { %1832 = vmatprep.mubr.msk.f32.mxu0 %vm2020_vm4, %v2018_v22  ;;  %1930 = vmatpush3.bf16.msra.mxu0 %v1929_v14 }
0x1915   :  { %v1809_v32 = vpop.f32.mrb[10].mxu0 }
0x1916   :  { %1262 = vperm.xlu1 %1938, %v1809_v32   ;;  %v1239_v21 = vpop.f32.mrb[11].mxu0 }
0x1917   :  { %1257 = vperm.xlu0 %1937, %v1239_v21  }
0x1995   :  { %v1263_v30 = vpop.permute.xlu1 %1262 }
0x1996   :  { %v1266_v31 = vsel %vm1254_vm7, %v1263_v30, -1e+30  ;;  %v1258_v33 = vpop.permute.xlu0 %1257 }
0x1997   :  { %v1269_v34 = vsel %vm1267_vm8, %v1266_v31, -inf  ;;  %v1265_v35 = vsel %vm1253_vm9, %v1258_v33, -1e+30 }
0x1998   :  { %v1268_v36 = vsel %vm1267_vm8, %v1265_v35, -inf }
0x1999   :  { %v1270_v37 = vmax.f32 %v1268_v36, %v1269_v34 }
0x199b   :  { %v1271_v38 = vrot.slane %v1270_v37, 4 }
0x199d   :  { %v1272_v39 = vmax.f32 %v1270_v37, %v1271_v38 }
0x199f   :  { %v1273_v19 = vrot.slane %v1272_v39, 2 }
0x19a1   :  { %v1274_v40 = vmax.f32 %v1272_v39, %v1273_v19 }
0x19a3   :  { %v1275_v41 = vrot.slane %v1274_v40, 1 }
0x19a5   :  { %v1276_v42 = vmax.f32 %v1274_v40, %v1275_v41 }
0x19a7   :  { %v1277_v43 = vsub.f32 %v1265_v35, %v1276_v42  ;;  %v1278_v44 = vsub.f32 %v1266_v31, %v1276_v42 }
0x19a9   :  { %v1279_v45 = vmul.f32 1.442695, %v1277_v43  ;;  %v1281_v46 = vmul.f32 1.442695, %v1278_v44 }
0x19ab   :  { %2007 = vpow2.f32 %v1279_v45 }
0x19ac   :  { %2009 = vpow2.f32 %v1281_v46 }
0x19b5   :  { %v2008_v47 = vpop.eup %2007 }
0x19b6   :  { %v2010_v48 = vpop.eup %2009  ;;  %v1283_v49 = vsel %vm1267_vm8, %v2008_v47, 0.0 }
0x19b7   :  { %v1284_v50 = vsel %vm1267_vm8, %v2010_v48, 0.0 }
0x19b8   :  { %v1285_v51 = vadd.f32 %v1284_v50, %v1283_v49 }
0x19ba   :  { %v1286_v52 = vrot.slane %v1285_v51, 4 }
0x19bc   :  { %v1287_v53 = vadd.f32 %v1286_v52, %v1285_v51 }
0x19be   :  { %v1288_v54 = vrot.slane %v1287_v53, 2 }
0x19c0   :  { %v1289_v55 = vadd.f32 %v1288_v54, %v1287_v53 }
0x19c2   :  { %v1290_v56 = vrot.slane %v1289_v55, 1 }
0x19c4   :  { %v1291_v57 = vadd.f32 %v1290_v56, %v1289_v55 }
0x19c6   :  { %2011 = vrcp.f32 %v1291_v57 }
0x19d0   :  { %v2012_v58 = vpop.eup %2011 }
0x19d1   :  { %v1294_v59 = vmul.f32 %v2012_v58, %v2010_v48  ;;  %v1293_v60 = vmul.f32 %v2012_v58, %v2008_v47 }
0x19d3   :  { %v1298_v61 = vsel %vm1267_vm8, %v1294_v59, 0.0  ;;  %v1295_v62 = vsel %vm1267_vm8, %v1293_v60, 0.0 }
0x19d4   :  { %1299 = vadd.xlane.f32.xlu1 %v1298_v61  ;;  %1296 = vadd.xlane.f32.xlu0 %v1295_v62 }
0x1a61   :  { %v1300_v0 = vpop.xlane.xlu1 %1299  ;;  %v1297_v1 = vpop.xlane.xlu0 %1296 }
0x1a62   :  { %v1306_v2 = vmul.f32 %v1300_v0, %v2263_v9  ;;  %v1305_v3 = vmul.f32 %v1297_v1, %v2235_v27  ;;  %v1383_v27 = vld [vmem:[%s2340_s7 + $0x10] sm:$0xff] }
0x1a63   :  { %v1926_v9 = vpack.c.bf16 %v1384_v8, %v1383_v27 }
0x1a64   :  { %v1920_v6 = vpack.c.bf16 %v1306_v2, %v1305_v3 }
0x1a66   :  { %1921 = vmatpush3.bf16.msra.mxu1 %v1920_v6 }
0x1a67   :  { %1922 = vmatprep.subr.bf16.mxu1 %v2019_v28 }
0x1a69   :  { %1815 = vmatmul.mubr.msk.f32.vlgmr.msra.gmra.mrb[12].mxu1 %vm1307_vm11, %v1587_v7 }
0x1a6a   :  { %1924 = vmatpush3.bf16.msra.mxu1 %v1923_v20  ;;  %1825 = vmatprep.mubr.msk.f32.mxu1 %vm2020_vm4, %v2018_v22  ;;  %v16_v22 = vstv %s2342_s10 }
0x1a6b   :  { %1925 = vmatprep.subr.bf16.mxu1 %v2019_v28  ;;  %17 = vst [vmem:[#allocation4] sm:$0x1] %v16_v22  ;;  %v1589_v28 = vld [vmem:[%s2343_s8] ss:$0 sm:$0xff] }
0x1a6e   :  { %1927 = vmatpush3.bf16.msra.mxu1 %v1926_v9 }
0x1a72   :  { %v1591_v18 = vld [vmem:[#allocation4] ss:$0 sm:$0xff] }
0x1b3c   :  { %v1377_v10 = vpop.f32.mrb[12].mxu1 }
0x1b3d   :  { %v1816_v11 = vpop.f32.mrb[13].mxu1  ;;  %1826 = vmatmul.mubr.msk.f32.vlgmr.msra.gmra.mrb[14].mxu1 %vm160_vm5, %v1377_v10 }
0x1c10   :  { %v1461_v15 = vpop.f32.mrb[14].mxu1 }
0x1c11   :  { %v1462_v29 = vadd.f32 %v1589_v28, %v1461_v15  ;;  %v1827_v16 = vpop.f32.mrb[15].mxu1 }
0x1c13   :  { %v1465_v17 = vmax.f32 %v1462_v29, 0.0 }
0x1c15   :  { %1833 = vmatmul.mubr.msk.f32.vlgmr.msra.gmra.mrb[12].mxu0 %vm1307_vm11, %v1465_v17 }
0x1ce8   :  { %v1544_v32 = vpop.f32.mrb[12].mxu0 }
0x1ce9   :  { %v1545_v21 = vadd.f32 %v1591_v18, %v1544_v32  ;;  %v1834_v23 = vpop.f32.mrb[13].mxu0 }
0x1ceb   :  { %v1593_v24 = vmul.f32 -1.442695, %v1545_v21 }
0x1ced   :  { %2013 = vpow2.f32 %v1593_v24 }
0x1cf7   :  { %v2014_v25 = vpop.eup %2013 }
0x1cf8   :  { %v1551_v26 = vadd.f32 1.0, %v2014_v25 }
0x1cfa   :  { %2015 = vrcp.f32 %v1551_v26 }
0x1d04   :  { %v2016_v30 = vpop.eup %2015 }
0x1d05   :  { %1555 = vst.msk [vmem:[%s2344_s11] sm:$0x3] %vm1554_vm12, %v2016_v30 }

</bundles_post_ra>
